<compile_context>
chip_gen: v5e
topology: v5e:2x2
jax: 0.10.0
libtpu: 0.0.40
codegen_flags: <defaults>
</compile_context>

<pallas_src>
import functools

import jax
import jax.numpy as jnp
import numpy as np
from jax import lax
from jax.experimental import pallas as pl
from jax.experimental.pallas import tpu as pltpu


def _vmem_limit_bytes():
    """Generation-aware VMEM budget: ~75% of physical, capped at 100 MiB."""
    cap = 64 * 1024 * 1024  # conservative default = v7x physical VMEM
    try:
        info = pltpu.get_tpu_info()
        cap = int(getattr(info, "vmem_capacity_bytes", cap) or cap)
    except Exception:
        pass
    return min((cap * 3) // 4, 100 * 1024 * 1024)


_VMEM_LIMIT = _vmem_limit_bytes()
_BIG_VMEM = _VMEM_LIMIT >= 72 * 1024 * 1024  # true on 128 MiB parts (v5e/v6e)


def _pick_tile(dim, target, align):
    """Largest multiple of `align` <= min(target, dim) that divides `dim`.

    Falls back to the full dimension (always a legal BlockSpec size) when no
    such multiple exists, e.g. for the small toy shapes in the self-test.
    """
    t = (min(target, dim) // align) * align
    while t >= align:
        if dim % t == 0:
            return t
        t -= align
    return dim


# ----------------------------------------------------------------------------
# Tiled linear kernel:  y = x @ W + b   (W stored as (in, out))
# K is the reduction grid axis (last); f32 accumulator lives in VMEM scratch.
# Operands are cast to bf16 for the MXU; accumulation stays f32.
# ----------------------------------------------------------------------------
def _linear_kernel(x_ref, w_ref, b_ref, o_ref, acc_ref):
    @pl.when(pl.program_id(2) == 0)
    def _():
        acc_ref[...] = jnp.zeros_like(acc_ref)

    acc_ref[...] += jnp.dot(x_ref[...].astype(jnp.bfloat16),
                            w_ref[...].astype(jnp.bfloat16),
                            preferred_element_type=jnp.float32)

    @pl.when(pl.program_id(2) == pl.num_programs(2) - 1)
    def _():
        o_ref[...] = (acc_ref[...] + b_ref[...].astype(jnp.float32)
                      ).astype(o_ref.dtype)


def pallas_linear(x, w, b):
    M, K = x.shape
    K2, Nout = w.shape
    assert K == K2 and b.shape == (Nout,)

    tm_target = 512 if _BIG_VMEM else 256     # bigger row tiles on 128 MiB parts
    tm = _pick_tile(M, tm_target, 8)          # sublane-aligned row tiles
    tn = _pick_tile(Nout, 512, 128)           # lane-dense output tiles
    tk = _pick_tile(K, 512, 128)              # lane-dense reduction tiles

    grid = (M // tm, Nout // tn, K // tk)
    return pl.pallas_call(
        _linear_kernel,
        out_shape=jax.ShapeDtypeStruct((M, Nout), x.dtype),
        grid=grid,
        in_specs=[
            pl.BlockSpec((tm, tk), lambda i, j, k: (i, k)),
            pl.BlockSpec((tk, tn), lambda i, j, k: (k, j)),
            pl.BlockSpec((1, tn), lambda i, j, k: (0, j)),
        ],
        out_specs=pl.BlockSpec((tm, tn), lambda i, j, k: (i, j)),
        scratch_shapes=[pltpu.VMEM((tm, tn), jnp.float32)],
        compiler_params=pltpu.CompilerParams(
            dimension_semantics=("parallel", "parallel", "arbitrary"),
            vmem_limit_bytes=_VMEM_LIMIT,
        ),
    )(x, w, b.reshape(1, Nout))


# ----------------------------------------------------------------------------
# Attention core: grid = (B, H, N/tq), all axes parallel.
#   q block   (1, 1, tq, D)   (scale folded into q before q@k^T)
#   k/v block (1, 1, N,  D)   (resident across the inner query-tile axis)
#   attn out  (1, 1, tq, N)   (lane-dense: N is the full last dim)
#   ctx  out  (1, 1, tq, D)   (full-D store; head merge happens outside)
# ----------------------------------------------------------------------------
def _attn_kernel(q_ref, k_ref, v_ref, attn_ref, ctx_ref, *, scale):
    q = (q_ref[0, 0] * scale).astype(jnp.bfloat16)        # (tq, D)
    k = k_ref[0, 0].astype(jnp.bfloat16)                  # (N,  D)

    # s = (q*scale) @ k^T, contracting the last dims directly.
    s = lax.dot_general(q, k, (((1,), (1,)), ((), ())),
                        preferred_element_type=jnp.float32)          # (tq, N)
    s = s - jnp.max(s, axis=-1, keepdims=True)
    e = jnp.exp(s)
    # Exact reciprocal so the stored attention rows sum to 1.
    p = e / jnp.sum(e, axis=-1, keepdims=True)

    attn_ref[0, 0] = p.astype(attn_ref.dtype)

    ctx = lax.dot_general(p.astype(jnp.bfloat16),
                          v_ref[0, 0].astype(jnp.bfloat16),
                          (((1,), (0,)), ((), ())),
                          preferred_element_type=jnp.float32)        # (tq, D)
    ctx_ref[0, 0] = ctx.astype(ctx_ref.dtype)


def pallas_attention_core(q, k, v, scale, *, tq_target=256):
    B, H, N, D = q.shape
    assert k.shape == (B, H, N, D) and v.shape == (B, H, N, D)
    tq = _pick_tile(N, tq_target, 8)
    kernel = functools.partial(_attn_kernel, scale=scale)
    grid = (B, H, N // tq)
    return pl.pallas_call(
        kernel,
        out_shape=(
            jax.ShapeDtypeStruct((B, H, N, N), q.dtype),   # attn
            jax.ShapeDtypeStruct((B, H, N, D), q.dtype),   # attn @ v
        ),
        grid=grid,
        in_specs=[
            pl.BlockSpec((1, 1, tq, D), lambda b, h, i: (b, h, i, 0)),
            pl.BlockSpec((1, 1, N, D), lambda b, h, i: (b, h, 0, 0)),
            pl.BlockSpec((1, 1, N, D), lambda b, h, i: (b, h, 0, 0)),
        ],
        out_specs=(
            pl.BlockSpec((1, 1, tq, N), lambda b, h, i: (b, h, i, 0)),
            pl.BlockSpec((1, 1, tq, D), lambda b, h, i: (b, h, i, 0)),
        ),
        compiler_params=pltpu.CompilerParams(
            dimension_semantics=("parallel", "parallel", "parallel"),
            vmem_limit_bytes=_VMEM_LIMIT,
        ),
    )(q, k, v)


# ----------------------------------------------------------------------------
# Full module forward
# ----------------------------------------------------------------------------
def attention_forward(x, w_qkv, b_qkv, w_proj, b_proj, num_heads):
    B, N, C = x.shape
    H = num_heads
    assert C % H == 0
    D = C // H
    scale = D ** (-0.5)

    # Fused qkv projection (tiled Pallas matmul).
    qkv = pallas_linear(x.reshape(B * N, C), w_qkv, b_qkv)     # (B*N, 3C)
    qkv = qkv.reshape(B, N, 3, H, D)

    # Head-major (B, H, N, D) layout so the attention core's BlockSpecs do the
    # head split with full-last-dim (lane-dense) blocks.
    q = jnp.transpose(qkv[:, :, 0], (0, 2, 1, 3))
    k = jnp.transpose(qkv[:, :, 1], (0, 2, 1, 3))
    v = jnp.transpose(qkv[:, :, 2], (0, 2, 1, 3))

    attn, ctx = pallas_attention_core(q, k, v, scale)          # (B,H,N,N), (B,H,N,D)

    # Merge heads back to token-major (B*N, C) for the output projection.
    ctx = jnp.transpose(ctx, (0, 2, 1, 3)).reshape(B * N, C)
    y = pallas_linear(ctx, w_proj, b_proj).reshape(B, N, C)

    # attn_drop / proj_drop are p=0.0 -> identity.
    return y, attn


# Plain-JAX reference for correctness verification.
def attention_reference(x, w_qkv, b_qkv, w_proj, b_proj, num_heads):
    B, N, C = x.shape
    H = num_heads
    D = C // H
    scale = D ** (-0.5)
    qkv = (x.reshape(B * N, C) @ w_qkv + b_qkv).reshape(B, N, 3, H, D)
    qkv = qkv.transpose(2, 0, 3, 1, 4)
    q, k, v = qkv[0], qkv[1], qkv[2]
    s = jnp.einsum("bhnd,bhmd->bhnm", q, k) * scale
    attn = jax.nn.softmax(s, axis=-1)
    ctx = jnp.einsum("bhnm,bhmd->bhnd", attn, v)
    ctx = ctx.transpose(0, 2, 1, 3).reshape(B * N, C)
    y = (ctx @ w_proj + b_proj).reshape(B, N, C)
    return y, attn


if __name__ == "__main__":
    B, N, C = 2, 8, 32
    num_heads = 8     # head_dim = 4

    key = jax.random.PRNGKey(0)
    kx, k1, k2, k3 = jax.random.split(key, 4)

    x = jax.random.normal(kx, (B, N, C), dtype=jnp.float32)

    # Parameters (deterministic init).  Weights stored as (in, out).
    w_qkv = jax.random.normal(k1, (C, 3 * C), dtype=jnp.float32) * 0.02
    b_qkv = jnp.zeros((3 * C,), dtype=jnp.float32)   # qkv_bias=False
    w_proj = jax.random.normal(k2, (C, C), dtype=jnp.float32) * 0.02
    b_proj = jax.random.normal(k3, (C,), dtype=jnp.float32) * 0.02

    y, attn = attention_forward(x, w_qkv, b_qkv, w_proj, b_proj, num_heads)
    y = jax.block_until_ready(y)
    attn = jax.block_until_ready(attn)

    y_ref, attn_ref = attention_reference(x, w_qkv, b_qkv, w_proj, b_proj, num_heads)

    # Matmul operands are bf16 (f32 accumulation / f32 softmax), so tolerances
    # reflect bf16 rounding; any structural error would be orders of magnitude
    # larger at these value scales.
    np.testing.assert_allclose(np.asarray(y), np.asarray(y_ref),
                               rtol=2e-2, atol=5e-3)
    np.testing.assert_allclose(np.asarray(attn), np.asarray(attn_ref),
                               rtol=2e-2, atol=5e-3)

    assert y.shape == (B, N, C) and attn.shape == (B, num_heads, N, N)
    print("KERNEL_OK")
</pallas_src>

<mosaic_0001>
module attributes {stable_mosaic.version = 11 : i64} {
  func.func @_linear_kernel(%arg0: i32, %arg1: i32, %arg2: i32, %arg3: memref<16x32xf32, #tpu.memory_space<vmem>>, %arg4: memref<32x96xf32, #tpu.memory_space<vmem>>, %arg5: memref<1x96xf32, #tpu.memory_space<vmem>>, %arg6: memref<16x96xf32, #tpu.memory_space<vmem>>, %arg7: memref<16x96xf32, #tpu.memory_space<vmem>>) attributes {dimension_semantics = [#tpu.dimension_semantics<parallel>, #tpu.dimension_semantics<parallel>, #tpu.dimension_semantics<arbitrary>], iteration_bounds = array<i64: 1, 1, 1>, scalar_prefetch = 0 : i64, scratch_operands = 1 : i64, tpu.core_type = #tpu.core_type<tc>, window_params = [{transform_indices = @transform_0, window_bounds = array<i64: 16, 32>}, {transform_indices = @transform_1, window_bounds = array<i64: 32, 96>}, {transform_indices = @transform_2, window_bounds = array<i64: 1, 96>}, {transform_indices = @transform_3, window_bounds = array<i64: 16, 96>}]} {
    %c0_i32 = arith.constant 0 : i32
    %0 = arith.cmpi eq, %arg2, %c0_i32 : i32
    %1 = arith.extui %0 : i1 to i32
    %c0_i32_0 = arith.constant 0 : i32
    %2 = arith.cmpi ne, %1, %c0_i32_0 : i32
    scf.if %2 {
      %cst_10 = arith.constant 0.000000e+00 : f32
      %14 = vector.broadcast %cst_10 : f32 to vector<16x96xf32>
      %c0_11 = arith.constant 0 : index
      %c0_12 = arith.constant 0 : index
      %15 = vector.load %arg7[%c0_11, %c0_12] : memref<16x96xf32, #tpu.memory_space<vmem>>, vector<16x96xf32>
      tpu.vector_store %arg7[%c0_11, %c0_12], %14 {strides = array<i32>} : memref<16x96xf32, #tpu.memory_space<vmem>>, vector<16x96xf32>,
    } else {
    }
    %c0 = arith.constant 0 : index
    %c0_1 = arith.constant 0 : index
    %3 = vector.load %arg7[%c0, %c0_1] : memref<16x96xf32, #tpu.memory_space<vmem>>, vector<16x96xf32>
    %c0_2 = arith.constant 0 : index
    %c0_3 = arith.constant 0 : index
    %4 = vector.load %arg3[%c0_2, %c0_3] : memref<16x32xf32, #tpu.memory_space<vmem>>, vector<16x32xf32>
    %5 = arith.truncf %4 : vector<16x32xf32> to vector<16x32xbf16>
    %c0_4 = arith.constant 0 : index
    %c0_5 = arith.constant 0 : index
    %6 = vector.load %arg4[%c0_4, %c0_5] : memref<32x96xf32, #tpu.memory_space<vmem>>, vector<32x96xf32>
    %7 = arith.truncf %6 : vector<32x96xf32> to vector<32x96xbf16>
    %cst = arith.constant dense<0.000000e+00> : vector<16x96xf32>
    %8 = tpu.matmul %5, %7, %cst {dimension_numbers = #tpu.dot_dimension_numbers<[1], [0], [0], [1], [0, 0, 1, 1], [], []>} : vector<16x32xbf16>, vector<32x96xbf16>, vector<16x96xf32> -> vector<16x96xf32>
    %9 = arith.addf %3, %8 : vector<16x96xf32>
    %c0_6 = arith.constant 0 : index
    %c0_7 = arith.constant 0 : index
    %10 = vector.load %arg7[%c0_6, %c0_7] : memref<16x96xf32, #tpu.memory_space<vmem>>, vector<16x96xf32>
    tpu.vector_store %arg7[%c0_6, %c0_7], %9 {strides = array<i32>} : memref<16x96xf32, #tpu.memory_space<vmem>>, vector<16x96xf32>,
    %c0_i32_8 = arith.constant 0 : i32
    %11 = arith.cmpi eq, %arg2, %c0_i32_8 : i32
    %12 = arith.extui %11 : i1 to i32
    %c0_i32_9 = arith.constant 0 : i32
    %13 = arith.cmpi ne, %12, %c0_i32_9 : i32
    scf.if %13 {
      %c0_10 = arith.constant 0 : index
      %c0_11 = arith.constant 0 : index
      %14 = vector.load %arg7[%c0_10, %c0_11] : memref<16x96xf32, #tpu.memory_space<vmem>>, vector<16x96xf32>
      %c0_12 = arith.constant 0 : index
      %c0_13 = arith.constant 0 : index
      %15 = vector.load %arg5[%c0_12, %c0_13] : memref<1x96xf32, #tpu.memory_space<vmem>>, vector<1x96xf32>
      %16 = vector.broadcast %15 : vector<1x96xf32> to vector<16x96xf32>
      %17 = arith.addf %14, %16 : vector<16x96xf32>
      %c0_14 = arith.constant 0 : index
      %c0_15 = arith.constant 0 : index
      %18 = vector.load %arg6[%c0_14, %c0_15] : memref<16x96xf32, #tpu.memory_space<vmem>>, vector<16x96xf32>
      tpu.vector_store %arg6[%c0_14, %c0_15], %17 {strides = array<i32>} : memref<16x96xf32, #tpu.memory_space<vmem>>, vector<16x96xf32>,
    } else {
    }
    return
  }
  func.func @transform_0(%arg0: i32, %arg1: i32, %arg2: i32) -> (i32, i32) {
    %c0_i32 = arith.constant 0 : i32
    return %arg0, %arg2 : i32, i32
  }
  func.func @transform_1(%arg0: i32, %arg1: i32, %arg2: i32) -> (i32, i32) {
    %c0_i32 = arith.constant 0 : i32
    return %arg2, %arg1 : i32, i32
  }
  func.func @transform_2(%arg0: i32, %arg1: i32, %arg2: i32) -> (i32, i32) {
    %c0_i32 = arith.constant 0 : i32
    %c0_i32_0 = arith.constant 0 : i32
    return %c0_i32, %arg1 : i32, i32
  }
  func.func @transform_3(%arg0: i32, %arg1: i32, %arg2: i32) -> (i32, i32) {
    %c0_i32 = arith.constant 0 : i32
    return %arg0, %arg1 : i32, i32
  }
}

</mosaic_0001>

<bundles_post_ra>
// kernel: tpu_custom_call.1
= control target key start
LH: loop header
LB: loop body
LE: loop exit
PB: predicated region body
PF: predicated region fallthrough
CT: control target
= control target key end

     0   :  { %8 = vsyncpa [#allocation4], 0  ;;  %s261_s0 = inlined_call_operand.hbm [shape: f32[16,32], index: 0, kind: input, shape index: {}]   ;;  %s262_s1 = inlined_call_operand.hbm [shape: f32[32,96], index: 1, kind: input, shape index: {}]   ;;  %s263_s2 = inlined_call_operand.vmem [shape: f32[1,96], index: 2, kind: input, shape index: {}]   ;;  %s264_s3 = inlined_call_operand.hbm [shape: f32[16,96], index: 3, kind: output, shape index: {}]  }
   0x1   :  { %9 = vsyncpa [#allocation7], 0 }
   0x2   :  { %10 = vsyncpa [#allocation5], 0  ;;  %s15_s14 = sshll.u32 %s261_s0, 4  ;;  %s208_s15 = smov [#allocation3]   ;;  %s16_s14 = int_to_ptr.hbm [resolvable:$true] %s15_s14 }
   0x3   :  { %s17_s16 = sshll.u32 %s208_s15, 4  ;;  %s28_s19 = sshll.u32 %s262_s1, 4  ;;  %s18_s16 = int_to_ptr.vmem [resolvable:$true] %s17_s16  ;;  %s29_s19 = int_to_ptr.hbm [resolvable:$true] %s28_s19 }
   0x4   :  { %s209_s20 = smov 128   ;;  %s210_s21 = smov 8  }
   0x5   :  { %23 = dma.hbm_to_vmem [thread:$0]  %s16_s14, 256, %s18_s16, [#allocation4], %s209_s20, %s209_s20, %s210_s21  }
   0x6   :  { %s211_s22 = smov [#allocation6]  }
   0x7   :  { %s30_s23 = sshll.u32 %s211_s22, 4  ;;  %s31_s23 = int_to_ptr.vmem [resolvable:$true] %s30_s23 }
   0x8   :  { %36 = dma.hbm_to_vmem [thread:$0]  %s29_s19, 512, %s31_s23, [#allocation7], %s209_s20, %s209_s20, %s210_s21  }
   0x9   :  { %202 = dma.done.wait [#allocation4], 256  }
   0xa   :  { %203 = vsyncadd [#allocation4], 4294967040 }
   0xb   :  { %204 = dma.done.wait [#allocation7], 512  }
   0xc   :  { %205 = vsyncadd [#allocation7], 4294966784  ;;  %vm52_vm0 = vcmask 785408   ;;  %v212_v0 = vmov 0.0   ;;  %v62_v1 = vld [vmem:[#allocation6 + $0x10] sm:$0xff]  ;;  %v63_v2 = vld [vmem:[#allocation6 + $0x18] sm:$0xff] }
   0xd   :  { %53 = vst.msk [vmem:[#allocation2] sm:$0xff] %vm52_vm0, %v212_v0  ;;  %v60_v3 = vld [vmem:[#allocation6] sm:$0xff]  ;;  %v65_v4 = vpack.c.bf16 %v63_v2, %v62_v1  ;;  %v61_v5 = vld [vmem:[#allocation6 + $0x8] sm:$0xff]  ;;  %v57_v7 = vld [vmem:[#allocation3] sm:$0xff]  ;;  %vm66_vm1 = vcmask 261120   ;;  %s213_s24 = smov [#allocation8]  }
   0xe   :  { %54 = vst.msk [vmem:[#allocation2 + $0x8] sm:$0xff] %vm52_vm0, %v212_v0  ;;  %v64_v6 = vpack.c.bf16 %v61_v5, %v60_v3  ;;  %v58_v8 = vld [vmem:[#allocation3 + $0x8] sm:$0xff]  ;;  %v129_v14 = vld [vmem:[%s263_s2] ss:$0 sm:$0xff]  ;;  %s106_s25 = sshll.u32 %s213_s24, 4  ;;  %s108_s28 = sshll.u32 %s264_s3, 4  ;;  %s107_s25 = int_to_ptr.vmem [resolvable:$true] %s106_s25  ;;  %s109_s28 = int_to_ptr.hbm [resolvable:$true] %s108_s28 }
   0xf   :  { %76 = vmatpush.bf16.msra.mxu0 %v65_v4  ;;  %v59_v9 = vpack.c.bf16 %v58_v8, %v57_v7 }
  0x13   :  { %77 = vmatpush.bf16.msra.mxu0 %v64_v6 }
  0x14   :  { %v55_v10 = vld [vmem:[#allocation2] sm:$0xff] }
  0x15   :  { %v56_v13 = vld [vmem:[#allocation2 + $0x8] sm:$0xff] }
  0x16   :  { %122 = vmatmul.msk.bf16.vlgmr.msra.gmra.mxu0 %vm66_vm1, %v59_v9 }
  0x93   :  { %v79_v11 = vpop.f32.mrf.mxu0 }
  0x94   :  { %v84_v12 = vadd.f32 %v79_v11, %v55_v10 }
  0x96   :  { %87 = vst.msk [vmem:[#allocation2] sm:$0xff] %vm52_vm0, %v84_v12 }
  0x9b   :  { %v81_v15 = vpop.f32.mrf.mxu0 }
  0x9c   :  { %v85_v16 = vadd.f32 %v81_v15, %v56_v13 }
  0x9d   :  { %v92_v17 = vld [vmem:[#allocation2] sm:$0xff] }
  0x9e   :  { %88 = vst.msk [vmem:[#allocation2 + $0x8] sm:$0xff] %vm52_vm0, %v85_v16  ;;  %v98_v18 = vadd.f32 %v129_v14, %v92_v17 }
  0xa0   :  { %100 = vst.msk [vmem:[#allocation8] sm:$0xff] %vm52_vm0, %v98_v18 }
  0xa5   :  { %v93_v19 = vld [vmem:[#allocation2 + $0x8] sm:$0xff] }
  0xa6   :  { %v99_v20 = vadd.f32 %v129_v14, %v93_v19 }
  0xa8   :  { %101 = vst.msk [vmem:[#allocation8 + $0x8] sm:$0xff] %vm52_vm0, %v99_v20 }
  0xa9   :  { %114 = dma.vmem_to_hbm [thread:$0]  %s107_s25, 256, %s109_s28, [#allocation5], %s209_s20, %s209_s20, %s210_s21  }
  0xaa   :  { %206 = dma.done.wait [#allocation5], 256  }
  0xab   :  { %207 = vsyncadd [#allocation5], 4294967040 }
  0xac   :  { %119 = vsyncpa [#allocation4], 1 }
  0xad   :  { %120 = vsyncpa [#allocation7], 1 }
  0xae   :  { %121 = vsyncpa [#allocation5], 1 }

</bundles_post_ra>
